<compile_context>
chip_gen: v6e
topology: v6e:2x2x1
jax: 0.10.0
libtpu: 0.0.40
codegen_flags: <defaults>
</compile_context>

<pallas_src>
import jax
import jax.numpy as jnp
from jax.experimental import pallas as pl
from jax.experimental.pallas import tpu as pltpu

_LANE = 128
_VMEM_CAP = 48 * 1024 * 1024  # stay well under the 64 MiB v7x physical VMEM


def _round_up(x, m):
    return ((x + m - 1) // m) * m


def _pad2(x, rows, cols):
    return jnp.pad(x, ((0, rows - x.shape[0]), (0, cols - x.shape[1])))


def _pick_tile(n_pad, target):
    """Largest multiple of 128 <= target that divides n_pad (n_pad % 128 == 0)."""
    target = max(_LANE, min(target, n_pad))
    t = (target // _LANE) * _LANE
    while n_pad % t != 0:
        t -= _LANE
    return t


# ---------------------------------------------------------------------------
# Pallas kernels
# ---------------------------------------------------------------------------

def _xw_kernel(x_ref, w_ref, o_ref):
    """Row-tiled XW = X @ W (bf16 operands, f32 MXU accumulate, bf16 out)."""
    o_ref[...] = jnp.dot(
        x_ref[...], w_ref[...], preferred_element_type=jnp.float32
    ).astype(o_ref.dtype)


def _agg_project_kernel(a_ref, xw_ref, b_ref, wn_ref, xwn_ref, acc_ref):
    """One GCN layer fused with the next layer's projection.

    acc += A_blk @ XW[k*tk : (k+1)*tk, :]   (XW is a VMEM-resident block)
    At the last k-step:  H = relu(acc + b);  XW_next = H @ W_next  (bf16 out).
    """
    k = pl.program_id(1)
    tk = a_ref.shape[1]

    @pl.when(k == 0)
    def _():
        acc_ref[...] = jnp.zeros_like(acc_ref)

    start = pl.multiple_of(k * tk, tk)
    xw_blk = xw_ref[pl.ds(start, tk), :]
    acc_ref[...] += jnp.dot(a_ref[...], xw_blk,
                            preferred_element_type=jnp.float32)

    @pl.when(k == pl.num_programs(1) - 1)
    def _():
        # f32 elementwise epilogue (v5e-safe); cast only for the MXU matmul.
        h = jnp.maximum(acc_ref[...] + b_ref[...], 0.0)
        xwn_ref[...] = jnp.dot(
            h.astype(jnp.bfloat16), wn_ref[...],
            preferred_element_type=jnp.float32
        ).astype(xwn_ref.dtype)


def _agg_head_kernel(a_ref, xw_ref, b_ref, wo_ref, bo_ref, h_ref, z_ref,
                     acc_ref):
    """Last GCN layer fused with the Linear classifier head."""
    k = pl.program_id(1)
    tk = a_ref.shape[1]

    @pl.when(k == 0)
    def _():
        acc_ref[...] = jnp.zeros_like(acc_ref)

    start = pl.multiple_of(k * tk, tk)
    xw_blk = xw_ref[pl.ds(start, tk), :]
    acc_ref[...] += jnp.dot(a_ref[...], xw_blk,
                            preferred_element_type=jnp.float32)

    @pl.when(k == pl.num_programs(1) - 1)
    def _():
        h = jnp.maximum(acc_ref[...] + b_ref[...], 0.0)
        h_ref[...] = h.astype(h_ref.dtype)            # bf16 writeback
        z = jnp.dot(h.astype(jnp.bfloat16), wo_ref[...],
                    preferred_element_type=jnp.float32) + bo_ref[...]
        z_ref[...] = z.astype(z_ref.dtype)


# ---------------------------------------------------------------------------
# pallas_call wrappers
# ---------------------------------------------------------------------------

def _xw_call(x_p, w_p, tm):
    n_pad, f_in = x_p.shape
    f_out = w_p.shape[1]
    vmem = (2 * tm * f_in * 2 + 2 * f_in * f_out * 2 + 2 * tm * f_out * 2
            + (4 << 20))
    return pl.pallas_call(
        _xw_kernel,
        out_shape=jax.ShapeDtypeStruct((n_pad, f_out), jnp.bfloat16),
        grid_spec=pltpu.PrefetchScalarGridSpec(
            num_scalar_prefetch=0,
            grid=(n_pad // tm,),
            in_specs=[
                pl.BlockSpec((tm, f_in), lambda i: (i, 0)),
                pl.BlockSpec((f_in, f_out), lambda i: (0, 0)),
            ],
            out_specs=pl.BlockSpec((tm, f_out), lambda i: (i, 0)),
        ),
        compiler_params=pltpu.CompilerParams(
            dimension_semantics=("parallel",),
            vmem_limit_bytes=min(vmem, _VMEM_CAP)),
        cost_estimate=pl.CostEstimate(
            flops=2 * n_pad * f_in * f_out,
            transcendentals=0,
            bytes_accessed=(n_pad * f_in + f_in * f_out + n_pad * f_out) * 2),
    )(x_p, w_p)


def _agg_project_call(a_p, xw_p, b_p, w_next_p, tm, tk):
    n_pad = a_p.shape[0]
    f = xw_p.shape[1]
    vmem = (2 * tm * tk * 2            # A tiles (bf16, double-buffered)
            + 2 * n_pad * f * 2        # resident XW block (conservative x2)
            + 2 * tm * f * 2           # output tiles (bf16)
            + tm * f * 4               # f32 accumulator
            + 2 * (f * f * 2 + f * 4)  # W_next + bias constant blocks
            + (4 << 20))               # headroom
    return pl.pallas_call(
        _agg_project_kernel,
        out_shape=jax.ShapeDtypeStruct((n_pad, f), jnp.bfloat16),
        grid_spec=pltpu.PrefetchScalarGridSpec(
            num_scalar_prefetch=0,
            grid=(n_pad // tm, n_pad // tk),
            in_specs=[
                pl.BlockSpec((tm, tk), lambda i, k: (i, k)),     # A_hat tile
                pl.BlockSpec((n_pad, f), lambda i, k: (0, 0)),   # resident XW
                pl.BlockSpec((1, f), lambda i, k: (0, 0)),       # bias
                pl.BlockSpec((f, f), lambda i, k: (0, 0)),       # W_next
            ],
            out_specs=pl.BlockSpec((tm, f), lambda i, k: (i, 0)),
            scratch_shapes=[pltpu.VMEM((tm, f), jnp.float32)],
        ),
        compiler_params=pltpu.CompilerParams(
            dimension_semantics=("parallel", "arbitrary"),
            vmem_limit_bytes=min(vmem, _VMEM_CAP)),
        cost_estimate=pl.CostEstimate(
            flops=2 * n_pad * n_pad * f + 2 * n_pad * f * f,
            transcendentals=0,
            bytes_accessed=(n_pad * n_pad + 2 * n_pad * f + f * f) * 2),
    )(a_p, xw_p, b_p, w_next_p)


def _agg_head_call(a_p, xw_p, b_p, w_out_p, b_out_p, tm, tk):
    n_pad = a_p.shape[0]
    f = xw_p.shape[1]
    c = w_out_p.shape[1]
    vmem = (2 * tm * tk * 2
            + 2 * n_pad * f * 2
            + 2 * tm * f * 2           # h out (bf16)
            + 2 * tm * c * 4           # z out (f32)
            + tm * f * 4               # accumulator
            + 2 * (f * c * 2 + c * 4 + f * 4)
            + (4 << 20))
    return pl.pallas_call(
        _agg_head_kernel,
        out_shape=(jax.ShapeDtypeStruct((n_pad, f), jnp.bfloat16),
                   jax.ShapeDtypeStruct((n_pad, c), jnp.float32)),
        grid_spec=pltpu.PrefetchScalarGridSpec(
            num_scalar_prefetch=0,
            grid=(n_pad // tm, n_pad // tk),
            in_specs=[
                pl.BlockSpec((tm, tk), lambda i, k: (i, k)),     # A_hat tile
                pl.BlockSpec((n_pad, f), lambda i, k: (0, 0)),   # resident XW
                pl.BlockSpec((1, f), lambda i, k: (0, 0)),       # GCN bias
                pl.BlockSpec((f, c), lambda i, k: (0, 0)),       # head weight
                pl.BlockSpec((1, c), lambda i, k: (0, 0)),       # head bias
            ],
            out_specs=(pl.BlockSpec((tm, f), lambda i, k: (i, 0)),
                       pl.BlockSpec((tm, c), lambda i, k: (i, 0))),
            scratch_shapes=[pltpu.VMEM((tm, f), jnp.float32)],
        ),
        compiler_params=pltpu.CompilerParams(
            dimension_semantics=("parallel", "arbitrary"),
            vmem_limit_bytes=min(vmem, _VMEM_CAP)),
        cost_estimate=pl.CostEstimate(
            flops=2 * n_pad * n_pad * f + 2 * n_pad * f * c,
            transcendentals=0,
            bytes_accessed=(n_pad * n_pad + n_pad * f + f * c + n_pad * f) * 2
                           + n_pad * c * 4),
    )(a_p, xw_p, b_p, w_out_p, b_out_p)


# ---------------------------------------------------------------------------
# Glue: normalized dense adjacency from edge_index (PyG gcn_norm semantics)
# ---------------------------------------------------------------------------

def build_a_hat(edge_index, num_nodes):
    """A_hat = D^{-1/2} (A + I) D^{-1/2}, with A[dst, src] = 1 per edge."""
    src = edge_index[0]
    dst = edge_index[1]
    a = jnp.zeros((num_nodes, num_nodes), jnp.float32)
    a = a.at[dst, src].add(1.0)
    a = a + jnp.eye(num_nodes, dtype=jnp.float32)        # add self loops
    deg = jnp.sum(a, axis=1)
    dinv = jnp.where(deg > 0, 1.0 / jnp.sqrt(deg), 0.0)
    return dinv[:, None] * a * dinv[None, :]


# ---------------------------------------------------------------------------
# Model: parameters + forward
# ---------------------------------------------------------------------------

def init_params(key, num_features, num_classes, hidden):
    ks = jax.random.split(key, 8)

    def w(k, fi, fo):
        return (jax.random.normal(k, (fi, fo), jnp.float32)
                / jnp.sqrt(jnp.float32(fi)))

    return {
        "w1": w(ks[0], num_features, hidden),
        "b1": jnp.zeros((1, hidden), jnp.float32),
        "w2": w(ks[1], hidden, hidden),
        "b2": jnp.zeros((1, hidden), jnp.float32),
        "w3": w(ks[2], hidden, hidden),
        "b3": jnp.zeros((1, hidden), jnp.float32),
        "w_out": w(ks[3], hidden, num_classes),
        "b_out": jax.random.normal(ks[4], (1, num_classes), jnp.float32) * 0.01,
    }


def gcn_forward(params, x, edge_index, *, tm=512, tk=4096):
    """Pallas forward: returns (h, z) exactly like the PyTorch module."""
    n, f_in = x.shape
    hidden = params["w1"].shape[1]
    n_classes = params["w_out"].shape[1]

    f_in_p = _round_up(f_in, _LANE)
    f_p = _round_up(hidden, _LANE)
    c_p = _round_up(n_classes, _LANE)

    # Pad rows only to the 128 lane width; tiles are chosen to divide n_pad.
    n_pad = _round_up(n, _LANE)
    tm = _pick_tile(n_pad, tm)
    tk = _pick_tile(n_pad, tk)
    # Prefer an even row-tile count (v7x megacore balance) when tiles stay big.
    if (n_pad // tm) % 2 == 1 and tm >= 4 * _LANE and tm % (2 * _LANE) == 0:
        tm //= 2

    # Normalized adjacency, padded + bf16 (halves the dominant N^2 HBM bytes).
    a_p = _pad2(build_a_hat(edge_index, n), n_pad, n_pad).astype(jnp.bfloat16)
    x_p = _pad2(x, n_pad, f_in_p).astype(jnp.bfloat16)

    w1 = _pad2(params["w1"], f_in_p, f_p).astype(jnp.bfloat16)
    w2 = _pad2(params["w2"], f_p, f_p).astype(jnp.bfloat16)
    w3 = _pad2(params["w3"], f_p, f_p).astype(jnp.bfloat16)
    wo = _pad2(params["w_out"], f_p, c_p).astype(jnp.bfloat16)
    b1 = _pad2(params["b1"], 1, f_p)
    b2 = _pad2(params["b2"], 1, f_p)
    b3 = _pad2(params["b3"], 1, f_p)
    bo = _pad2(params["b_out"], 1, c_p)

    xw1 = _xw_call(x_p, w1, tm)                           # X @ W1
    xw2 = _agg_project_call(a_p, xw1, b1, w2, tm, tk)     # relu(A@XW1+b1) @ W2
    xw3 = _agg_project_call(a_p, xw2, b2, w3, tm, tk)     # relu(A@XW2+b2) @ W3
    h_p, z_p = _agg_head_call(a_p, xw3, b3, wo, bo, tm, tk)

    h = h_p[:n, :hidden].astype(jnp.float32)
    z = z_p[:n, :n_classes]
    return h, z


# ---------------------------------------------------------------------------
# References
# ---------------------------------------------------------------------------

def gcn_forward_ref_f32(params, x, edge_index):
    """Pure f32 reference (mirrors the original PyTorch module)."""
    n = x.shape[0]
    a_hat = build_a_hat(edge_index, n)
    h = x
    for wk, bk in (("w1", "b1"), ("w2", "b2"), ("w3", "b3")):
        h = jnp.maximum(a_hat @ (h @ params[wk]) + params[bk], 0.0)
    z = h @ params["w_out"] + params["b_out"]
    return h, z


def gcn_forward_ref_bf16(params, x, edge_index):
    """Reference matching the kernel numerics (bf16 operands, f32 accumulate)."""
    f32 = jnp.float32
    q = lambda v: v.astype(jnp.bfloat16).astype(f32)

    def mm(a, b):
        return jnp.dot(q(a), q(b), precision=jax.lax.Precision.HIGHEST)

    n = x.shape[0]
    a_hat = build_a_hat(edge_index, n)
    xw = q(mm(x, params["w1"]))
    h = jnp.maximum(mm(a_hat, xw) + params["b1"], 0.0)
    xw = q(mm(h, params["w2"]))
    h = jnp.maximum(mm(a_hat, xw) + params["b2"], 0.0)
    xw = q(mm(h, params["w3"]))
    h = jnp.maximum(mm(a_hat, xw) + params["b3"], 0.0)
    z = mm(h, params["w_out"]) + params["b_out"]
    return h, z


# ---------------------------------------------------------------------------
if __name__ == "__main__":
    num_nodes = 16
    num_features = 8
    hidden = 32
    num_classes = 4

    key = jax.random.PRNGKey(0)
    k_x, k_p = jax.random.split(key)

    # Node features [N, F]
    x = jax.random.normal(k_x, (num_nodes, num_features), jnp.float32)

    # Ring graph with symmetric edges: edge_index shape [2, 2*N]
    idx = jnp.arange(num_nodes, dtype=jnp.int32)
    nxt = (idx + 1) % num_nodes
    edge_index = jnp.stack(
        [jnp.concatenate([idx, nxt]), jnp.concatenate([nxt, idx])], axis=0
    )

    params = init_params(k_p, num_features, num_classes, hidden)

    h, z = gcn_forward(params, x, edge_index)
    h = jax.block_until_ready(h)
    z = jax.block_until_ready(z)

    assert h.shape == (num_nodes, hidden) and z.shape == (num_nodes, num_classes)

    # Strict check against a reference with the same bf16/f32 numerics.
    h_q, z_q = gcn_forward_ref_bf16(params, x, edge_index)
    assert jnp.allclose(h, h_q, atol=1e-2, rtol=1e-2), "h mismatch (bf16 ref)"
    assert jnp.allclose(z, z_q, atol=1e-2, rtol=1e-2), "z mismatch (bf16 ref)"

    # Loose check against the pure-f32 semantics of the original module.
    h_f, z_f = gcn_forward_ref_f32(params, x, edge_index)
    assert jnp.allclose(h, h_f, atol=1e-1, rtol=1e-1), "h mismatch (f32 ref)"
    assert jnp.allclose(z, z_f, atol=1e-1, rtol=1e-1), "z mismatch (f32 ref)"

    print("KERNEL_OK")
</pallas_src>

<mosaic_0001>
module attributes {stable_mosaic.version = 11 : i64} {
  func.func @_xw_kernel(%arg0: i32, %arg1: memref<128x128xbf16, #tpu.memory_space<vmem>>, %arg2: memref<128x128xbf16, #tpu.memory_space<vmem>>, %arg3: memref<128x128xbf16, #tpu.memory_space<vmem>>) attributes {dimension_semantics = [#tpu.dimension_semantics<parallel>], iteration_bounds = array<i64: 1>, scalar_prefetch = 0 : i64, scratch_operands = 0 : i64, tpu.core_type = #tpu.core_type<tc>, window_params = [{transform_indices = @transform_0, window_bounds = array<i64: 128, 128>}, {pipeline_mode = #tpu.pipeline_mode<synchronous>, transform_indices = @transform_1, window_bounds = array<i64: 128, 128>}, {transform_indices = @transform_2, window_bounds = array<i64: 128, 128>}]} {
    %c0 = arith.constant 0 : index
    %c0_0 = arith.constant 0 : index
    %0 = vector.load %arg1[%c0, %c0_0] : memref<128x128xbf16, #tpu.memory_space<vmem>>, vector<128x128xbf16>
    %c0_1 = arith.constant 0 : index
    %c0_2 = arith.constant 0 : index
    %1 = vector.load %arg2[%c0_1, %c0_2] : memref<128x128xbf16, #tpu.memory_space<vmem>>, vector<128x128xbf16>
    %cst = arith.constant dense<0.000000e+00> : vector<128x128xf32>
    %2 = tpu.matmul %0, %1, %cst {dimension_numbers = #tpu.dot_dimension_numbers<[1], [0], [0], [1], [0, 0, 1, 1], [], []>} : vector<128x128xbf16>, vector<128x128xbf16>, vector<128x128xf32> -> vector<128x128xf32>
    %3 = arith.truncf %2 : vector<128x128xf32> to vector<128x128xbf16>
    %c0_3 = arith.constant 0 : index
    %c0_4 = arith.constant 0 : index
    %4 = vector.load %arg3[%c0_3, %c0_4] : memref<128x128xbf16, #tpu.memory_space<vmem>>, vector<128x128xbf16>
    tpu.vector_store %arg3[%c0_3, %c0_4], %3 {strides = array<i32>} : memref<128x128xbf16, #tpu.memory_space<vmem>>, vector<128x128xbf16>,
    return
  }
  func.func @transform_0(%arg0: i32) -> (i32, i32) {
    %c0_i32 = arith.constant 0 : i32
    %c0_i32_0 = arith.constant 0 : i32
    return %arg0, %c0_i32 : i32, i32
  }
  func.func @transform_1(%arg0: i32) -> (i32, i32) {
    %c0_i32 = arith.constant 0 : i32
    %c0_i32_0 = arith.constant 0 : i32
    %c0_i32_1 = arith.constant 0 : i32
    return %c0_i32, %c0_i32_0 : i32, i32
  }
  func.func @transform_2(%arg0: i32) -> (i32, i32) {
    %c0_i32 = arith.constant 0 : i32
    %c0_i32_0 = arith.constant 0 : i32
    return %arg0, %c0_i32 : i32, i32
  }
}

</mosaic_0001>

<bundles_post_ra>
// kernel: tpu_custom_call.1
= control target key start
LH: loop header
LB: loop body
LE: loop exit
PB: predicated region body
PF: predicated region fallthrough
CT: control target
= control target key end

     0   :  { %7 = vsyncpa [#allocation3], 0  ;;  %s648_s0 = inlined_call_operand.hbm [shape: bf16[128,128], index: 0, kind: input, shape index: {}]   ;;  %s649_s1 = inlined_call_operand.hbm [shape: bf16[128,128], index: 1, kind: input, shape index: {}]   ;;  %s650_s2 = inlined_call_operand.hbm [shape: bf16[128,128], index: 2, kind: output, shape index: {}]  }
   0x1   :  { %8 = vsyncpa [#allocation6], 0 }
   0x2   :  { %9 = vsyncpa [#allocation4], 0  ;;  %s610_s9 = smov [#allocation2]  }
   0x3   :  { %s15_s10 = sshll.u32 %s610_s9, 4  ;;  %s16_s10 = int_to_ptr.vmem [resolvable:$true] %s15_s10 }
   0x4   :  { %s552_s11 = scalar_lea.vmem %s16_s10, 1024  ;;  %p557_p1 = scmp.lt.s32.totalorder %s16_s10, %s16_s10 }
   0x5   :  { %p553_p0 = scmp.ne.s32.totalorder %s16_s10, %s552_s11  ;;  %p558_p2 = scmp.lt.s32.totalorder %s552_s11, %s552_s11 }
   0x7   :  { %p559_p3 = por %p558_p2, %p557_p1 }
   0x9   :  { %p560_p4 = pnand %p559_p3, %p553_p0 }
   0xb   :  { %563 = shalt.err (!%p560_p4)
}
   0xc   :  { %s611_s12 = smov 64   ;;  %s612_s13 = smov 4  }
   0xd   :  { %21 = dma.hbm_to_vmem [thread:$0]  %s648_s0, 1024, %s16_s10, [#allocation3], %s611_s12, %s611_s12, %s612_s13  }
   0xe   :  { %s613_s16 = smov [#allocation5]  }
   0xf   :  { %s27_s17 = sshll.u32 %s613_s16, 4  ;;  %s28_s17 = int_to_ptr.vmem [resolvable:$true] %s27_s17 }
  0x10   :  { %s572_s18 = scalar_lea.vmem %s28_s17, 1024  ;;  %p577_p6 = scmp.lt.s32.totalorder %s28_s17, %s28_s17 }
  0x11   :  { %p573_p5 = scmp.ne.s32.totalorder %s28_s17, %s572_s18  ;;  %p578_p7 = scmp.lt.s32.totalorder %s572_s18, %s572_s18 }
  0x13   :  { %p579_p8 = por %p578_p7, %p577_p6 }
  0x15   :  { %p580_p9 = pnand %p579_p8, %p573_p5 }
  0x17   :  { %583 = shalt.err (!%p580_p9)
}
  0x18   :  { %33 = dma.hbm_to_vmem [thread:$0]  %s649_s1, 1024, %s28_s17, [#allocation6], %s611_s12, %s611_s12, %s612_s13  }
  0x19   :  { %604 = dma.done.wait [#allocation3], 1024  }
  0x1a   :  { %605 = vsyncadd [#allocation3], 4294966272 }
  0x1b   :  { %606 = dma.done.wait [#allocation6], 1024  }
  0x1c   :  { %607 = vsyncadd [#allocation6], 4294966272  ;;  %v528_v0 = vld [vmem:[#allocation5 + $0x38] sm:$0xff]   ;;  %v529_v1 = vld [vmem:[#allocation5 + $0x30] sm:$0xff]   ;;  %s614_s0 = smov [#allocation7]  }
  0x1d   :  { %475 = vmatprep.subr.bf16.mxu0 %v528_v0  ;;  %507 = vmatprep.subr.bf16.mxu1 %v528_v0  ;;  %v530_v2 = vld [vmem:[#allocation5 + $0x28] sm:$0xff]   ;;  %v531_v3 = vld [vmem:[#allocation5 + $0x20] sm:$0xff]   ;;  %v532_v6 = vld [vmem:[#allocation5 + $0x18] sm:$0xff]   ;;  %s351_s1 = sshll.u32 %s614_s0, 4  ;;  %s352_s1 = int_to_ptr.vmem [resolvable:$true] %s351_s1 }
  0x1e   :  { %476 = vmatpush3.bf16.msra.mxu0 %v528_v0  ;;  %515 = vmatpush3.bf16.msra.mxu1 %v528_v0  ;;  %v536_v4 = vld [vmem:[#allocation2] sm:$0xff]   ;;  %v533_v7 = vld [vmem:[#allocation5 + $0x10] sm:$0xff]   ;;  %v534_v8 = vld [vmem:[#allocation5 + $0x8] sm:$0xff]   ;;  %s584_s21 = scalar_lea.vmem %s352_s1, 1024  ;;  %p589_p11 = scmp.lt.s32.totalorder %s352_s1, %s352_s1 }
  0x1f   :  { %477 = vmatprep.subr.bf16.mxu0 %v529_v1  ;;  %508 = vmatprep.subr.bf16.mxu1 %v529_v1  ;;  %v537_v5 = vld [vmem:[#allocation2 + $0x20] sm:$0xff]   ;;  %v538_v10 = vld [vmem:[#allocation2 + $0x8] sm:$0xff]   ;;  %v540_v12 = vld [vmem:[#allocation2 + $0x10] sm:$0xff]   ;;  %p585_p10 = scmp.ne.s32.totalorder %s352_s1, %s584_s21  ;;  %p590_p12 = scmp.lt.s32.totalorder %s584_s21, %s584_s21 }
  0x20   :  { %491 = vmatprep.mubr.bf16.mxu0 %v536_v4  ;;  %499 = vmatprep.mubr.bf16.mxu1 %v537_v5  ;;  %v535_v9 = vld [vmem:[#allocation5] sm:$0xff]   ;;  %v539_v11 = vld [vmem:[#allocation2 + $0x28] sm:$0xff]   ;;  %v541_v13 = vld [vmem:[#allocation2 + $0x30] sm:$0xff]  }
  0x21   :  { %v542_v14 = vld [vmem:[#allocation2 + $0x18] sm:$0xff]   ;;  %p591_p13 = por %p590_p12, %p589_p11 }
  0x22   :  { %478 = vmatpush3.bf16.msra.mxu0 %v529_v1  ;;  %516 = vmatpush3.bf16.msra.mxu1 %v529_v1  ;;  %v543_v15 = vld [vmem:[#allocation2 + $0x38] sm:$0xff]  }
  0x23   :  { %479 = vmatprep.subr.bf16.mxu0 %v530_v2  ;;  %509 = vmatprep.subr.bf16.mxu1 %v530_v2  ;;  %p592_p0 = pnand %p591_p13, %p585_p10 }
  0x26   :  { %480 = vmatpush3.bf16.msra.mxu0 %v530_v2  ;;  %517 = vmatpush3.bf16.msra.mxu1 %v530_v2 }
  0x27   :  { %481 = vmatprep.subr.bf16.mxu0 %v531_v3  ;;  %510 = vmatprep.subr.bf16.mxu1 %v531_v3 }
  0x2a   :  { %482 = vmatpush3.bf16.msra.mxu0 %v531_v3  ;;  %518 = vmatpush3.bf16.msra.mxu1 %v531_v3 }
  0x2b   :  { %483 = vmatprep.subr.bf16.mxu0 %v532_v6  ;;  %511 = vmatprep.subr.bf16.mxu1 %v532_v6 }
  0x2e   :  { %484 = vmatpush3.bf16.msra.mxu0 %v532_v6  ;;  %519 = vmatpush3.bf16.msra.mxu1 %v532_v6 }
  0x2f   :  { %485 = vmatprep.subr.bf16.mxu0 %v533_v7  ;;  %512 = vmatprep.subr.bf16.mxu1 %v533_v7 }
  0x32   :  { %486 = vmatpush3.bf16.msra.mxu0 %v533_v7  ;;  %520 = vmatpush3.bf16.msra.mxu1 %v533_v7 }
  0x33   :  { %487 = vmatprep.subr.bf16.mxu0 %v534_v8  ;;  %513 = vmatprep.subr.bf16.mxu1 %v534_v8 }
  0x36   :  { %488 = vmatpush3.bf16.msra.mxu0 %v534_v8  ;;  %521 = vmatpush3.bf16.msra.mxu1 %v534_v8 }
  0x37   :  { %489 = vmatprep.subr.bf16.mxu0 %v535_v9  ;;  %514 = vmatprep.subr.bf16.mxu1 %v535_v9 }
  0x3a   :  { %490 = vmatpush3.bf16.msra.mxu0 %v535_v9  ;;  %522 = vmatpush3.bf16.msra.mxu1 %v535_v9 }
  0x3d   :  { %492 = vmatmul.mubr.bf16.vlgmr.msra.gmra.mxu0 %v538_v10  ;;  %500 = vmatmul.mubr.bf16.vlgmr.msra.gmra.mxu1 %v539_v11 }
  0x3e   :  { %495 = vmatprep.mubr.bf16.mxu0 %v540_v12  ;;  %503 = vmatprep.mubr.bf16.mxu1 %v541_v13 }
  0x45   :  { %496 = vmatmul.mubr.bf16.gmra.mxu0 %v542_v14  ;;  %504 = vmatmul.mubr.bf16.gmra.mxu1 %v543_v15 }
  0xfd   :  { %v493_v16 = vpop.f32.mrf.mxu0  ;;  %v501_v17 = vpop.f32.mrf.mxu1 }
  0xff   :  { %v203_v18 = vpop.f32.mrf.mxu0  ;;  %v235_v19 = vpop.f32.mrf.mxu1 }
 0x101   :  { %v494_v20 = vpop.f32.mrf.mxu0  ;;  %v502_v21 = vpop.f32.mrf.mxu1 }
 0x102   :  { %v420_v22 = vpack.c.bf16 %v494_v20, %v493_v16  ;;  %v440_v23 = vpack.c.bf16 %v502_v21, %v501_v17 }
 0x103   :  { %v206_v24 = vpop.f32.mrf.mxu0  ;;  %v238_v25 = vpop.f32.mrf.mxu1 }
 0x104   :  { %452 = vst [vmem:[#allocation7 + $0x8] sm:$0xff] %v420_v22   ;;  %456 = vst [vmem:[#allocation7 + $0x28] sm:$0xff] %v440_v23   ;;  %v415_v26 = vpack.c.bf16 %v206_v24, %v203_v18  ;;  %v435_v27 = vpack.c.bf16 %v238_v25, %v235_v19 }
 0x105   :  { %v497_v28 = vpop.f32.mrf.mxu0  ;;  %v505_v29 = vpop.f32.mrf.mxu1 }
 0x106   :  { %416 = vst [vmem:[#allocation7] sm:$0xff] %v415_v26   ;;  %455 = vst [vmem:[#allocation7 + $0x20] sm:$0xff] %v435_v27  }
 0x107   :  { %v219_v30 = vpop.f32.mrf.mxu0  ;;  %v251_v31 = vpop.f32.mrf.mxu1 }
 0x109   :  { %v498_v32 = vpop.f32.mrf.mxu0  ;;  %v506_v33 = vpop.f32.mrf.mxu1 }
 0x10a   :  { %v430_v34 = vpack.c.bf16 %v498_v32, %v497_v28  ;;  %v450_v35 = vpack.c.bf16 %v506_v33, %v505_v29 }
 0x10b   :  { %v222_v36 = vpop.f32.mrf.mxu0  ;;  %v254_v37 = vpop.f32.mrf.mxu1 }
 0x10c   :  { %454 = vst [vmem:[#allocation7 + $0x18] sm:$0xff] %v430_v34   ;;  %458 = vst [vmem:[#allocation7 + $0x38] sm:$0xff] %v450_v35   ;;  %v425_v38 = vpack.c.bf16 %v222_v36, %v219_v30  ;;  %v445_v39 = vpack.c.bf16 %v254_v37, %v251_v31 }
 0x10e   :  { %453 = vst [vmem:[#allocation7 + $0x10] sm:$0xff] %v425_v38   ;;  %457 = vst [vmem:[#allocation7 + $0x30] sm:$0xff] %v445_v39  }
 0x10f   :  { %595 = shalt.err (!%p592_p0)
}
 0x110   :  { %357 = dma.vmem_to_hbm [thread:$0]  %s352_s1, 1024, %s650_s2, [#allocation4], %s611_s12, %s611_s12, %s612_s13  }
 0x111   :  { %608 = dma.done.wait [#allocation4], 1024  }
 0x112   :  { %609 = vsyncadd [#allocation4], 4294966272 }
 0x113   :  { %361 = vsyncpa [#allocation3], 1 }
 0x114   :  { %362 = vsyncpa [#allocation6], 1 }
 0x115   :  { %363 = vsyncpa [#allocation4], 1 }

</bundles_post_ra>
